<compile_context>
chip_gen: v7x
topology: tpu7x:2x2x1
jax: 0.10.0
libtpu: 0.0.40
codegen_flags: <defaults>
</compile_context>

<pallas_src>
import functools

import jax
import jax.numpy as jnp
from jax import lax
from jax.experimental import pallas as pl
from jax.experimental.pallas import tpu as pltpu

LANE = 128


def _round_up(x, m):
    return ((x + m - 1) // m) * m


def _pack_factor(d):
    """How many D-wide lookups fit in one 128-lane output row."""
    return (LANE // d) if (d < LANE and LANE % d == 0) else 1


def make_packed_weight(weight):
    """Block-diagonal replicated weight -> lane-dense output rows.

    Cache this alongside the parameter and pass it to plane_registry_forward
    to avoid rebuilding the kron every call.
    """
    e, d = weight.shape
    pack = _pack_factor(d)
    if pack == 1:
        return weight
    return jnp.kron(jnp.eye(pack, dtype=weight.dtype), weight)


def _plane_registry_kernel(idx_ref, wbd_ref, o_ref, *, entries, pack):
    """Packed embedding gather (one-hot matmul on the MXU).

    idx_ref : (PR, TR)     int32 VMEM -- transposed index slab (lane dim = rows)
    wbd_ref : (P*E, P*D)   f32   VMEM -- block-diagonal replicated weight
    o_ref   : (TR, P*D)    f32   VMEM -- lane-dense output slab
    """
    tr = o_ref.shape[0]
    pe = wbd_ref.shape[0]                                   # P * E

    # Lane-major -> sublane-major: one small XLU transpose of the index tile
    # (replaces the old lane-sparse (TR, P) block and its strided DMA).
    idx_t = idx_ref[...].T                                  # (TR, PR) int32
    valid = (idx_t >= 0) & (idx_t < entries)
    # Sentinel guarantees no one-hot match for invalid indices (keeps the
    # corresponding output segment all-zero, no cross-segment pollution).
    safe = jnp.where(valid, idx_t, jnp.int32(-(pe + 1)))

    col = lax.broadcasted_iota(jnp.int32, (tr, pe), 1)      # (TR, P*E)
    onehot = jnp.zeros((tr, pe), jnp.float32)
    for p in range(pack):                                   # pack is tiny
        onehot = onehot + (col == (safe[:, p:p + 1] + p * entries)).astype(
            jnp.float32)

    # one-hot(idx) @ block_diag(W, ..., W)  ==  packed gather of W rows.
    o_ref[...] = jnp.dot(
        onehot, wbd_ref[...], preferred_element_type=jnp.float32
    ).astype(o_ref.dtype)


def plane_registry_forward(weight, x, *, packed_weight=None, tile_rows=2048,
                           min_pallas_n=1024):
    """weight: (E, D) f32, x: int array of any shape -> x.shape + (D,)."""
    e, d = weight.shape
    orig_shape = x.shape
    idx_flat = x.reshape(-1).astype(jnp.int32)
    n = idx_flat.shape[0]

    # Small-N fast path: a Pallas launch is pure fixed overhead on a 2 KiB table.
    if n < min_pallas_n:
        return jnp.take(weight, idx_flat, axis=0).reshape(*orig_shape, d)

    pack = _pack_factor(d)
    dp = pack * d                                           # output row width
    pe = pack * e
    if packed_weight is None:
        packed_weight = make_packed_weight(weight)
    assert packed_weight.shape == (pe, dp), packed_weight.shape

    rows = pl.cdiv(n, pack)                                 # packed output rows
    # >=2 grid steps when possible (v7x megacore); rows per tile are a multiple
    # of 128 so index (lane) and output (sublane) blocks stay (8,128)-aligned.
    tr = _round_up(min(tile_rows, max(pl.cdiv(rows, 2), 1)), LANE)

    pack_rows = max(pack, 8)                 # sublane-pad the transposed slab
    w_bytes = _round_up(pe, 8) * _round_up(dp, LANE) * 4

    # Generation-aware VMEM cap (v7x: 64 MiB physical per TensorCore).
    try:
        phys_vmem = int(pltpu.get_tpu_info().vmem_capacity_bytes)
    except Exception:
        phys_vmem = 64 << 20
    cap = min(96 << 20, (phys_vmem * 3) // 4)

    def _budget(tr_):
        idx_b = _round_up(pack_rows, 8) * tr_ * 4
        out_b = tr_ * _round_up(dp, LANE) * 4
        return 2 * (idx_b + out_b) + 2 * w_bytes + (8 << 20)

    while _budget(tr) > cap and tr > LANE:
        tr = _round_up(max(tr // 2, LANE), LANE)

    rows_pad = _round_up(rows, tr)
    n_pad = rows_pad * pack
    grid = rows_pad // tr
    vmem_limit = int(min(_budget(tr), cap))

    # Indices, padded with valid index 0, transposed so the lane dim is rows
    # (contiguous DMA, lane-dense index tiles) and sublane-padded to >=8 rows.
    idx2d = jnp.pad(idx_flat, (0, n_pad - n)).reshape(rows_pad, pack)
    idx_t = jnp.pad(idx2d.T, ((0, pack_rows - pack), (0, 0)))   # (PR, rows_pad)

    kernel = functools.partial(_plane_registry_kernel, entries=e, pack=pack)

    out = pl.pallas_call(
        kernel,
        out_shape=jax.ShapeDtypeStruct((rows_pad, dp), weight.dtype),
        grid=(grid,),
        in_specs=[
            pl.BlockSpec((pack_rows, tr), lambda i: (0, i)),   # index slab tiles
            pl.BlockSpec((pe, dp), lambda i: (0, 0)),          # resident weight
        ],
        out_specs=pl.BlockSpec((tr, dp), lambda i: (i, 0)),
        compiler_params=pltpu.CompilerParams(
            dimension_semantics=("parallel",),
            vmem_limit_bytes=vmem_limit,
        ),
        cost_estimate=pl.CostEstimate(
            flops=2 * rows_pad * pe * dp,
            transcendentals=0,
            bytes_accessed=4 * (pack_rows * rows_pad + pe * dp + rows_pad * dp),
        ),
    )(idx_t, packed_weight)

    # (rows_pad, P*D) -> (rows_pad*P, D) -> drop padding -> x.shape + (D,)
    return out.reshape(rows_pad * pack, d)[:n].reshape(*orig_shape, d)


def init_plane_registry_params(key, entries, dim):
    """nn.Embedding default init N(0,1), then abs_() as in the module __init__."""
    w = jax.random.normal(key, (entries, dim), dtype=jnp.float32)
    return jnp.abs(w)


if __name__ == "__main__":
    # cfg.DIMENSION = 32, cfg.BOX_REGISTRY.ENTRIES = 16
    ENTRIES, DIM = 16, 32
    key = jax.random.PRNGKey(0)
    k_w, k1, k2, k3, k4 = jax.random.split(key, 5)

    weight = init_plane_registry_params(k_w, ENTRIES, DIM)
    packed = make_packed_weight(weight)          # cache once, reuse per forward

    # Small shapes hit the jnp.take fast path; larger ones run the Pallas
    # kernel with a multi-step "parallel" grid.  min_pallas_n=0 forces the
    # kernel on a ragged shape to exercise the padding path.
    cases = [
        ((2, 8), dict()),                        # primary small case (fast path)
        ((3, 5, 7), dict(min_pallas_n=0)),       # kernel, grid=1, padding path
        ((2048,), dict()),                       # kernel, 2 tiles of 256 rows
        ((2, 4096), dict()),                     # kernel, 2 tiles of 1024 rows
    ]
    for ks, (shape, kw) in zip((k1, k2, k3, k4), cases):
        x = jax.random.randint(ks, shape, 0, ENTRIES, dtype=jnp.int32)
        out = jax.block_until_ready(
            plane_registry_forward(weight, x, packed_weight=packed, **kw))
        ref = jnp.take(weight, x, axis=0)
        assert out.shape == shape + (DIM,), (out.shape, shape)
        assert jnp.allclose(out, ref, atol=1e-6), f"mismatch for shape {shape}"

    print("KERNEL_OK")
</pallas_src>

<mosaic_0001>
module attributes {stable_mosaic.version = 11 : i64} {
  func.func @_plane_registry_kernel(%arg0: i32, %arg1: memref<8x128xi32, #tpu.memory_space<vmem>>, %arg2: memref<64x128xf32, #tpu.memory_space<vmem>>, %arg3: memref<128x128xf32, #tpu.memory_space<vmem>>) attributes {dimension_semantics = [#tpu.dimension_semantics<parallel>], iteration_bounds = array<i64: 1>, scalar_prefetch = 0 : i64, scratch_operands = 0 : i64, tpu.core_type = #tpu.core_type<tc>, window_params = [{transform_indices = @transform_0, window_bounds = array<i64: 8, 128>}, {pipeline_mode = #tpu.pipeline_mode<synchronous>, transform_indices = @transform_1, window_bounds = array<i64: 64, 128>}, {transform_indices = @transform_2, window_bounds = array<i64: 128, 128>}]} {
    %c0 = arith.constant 0 : index
    %c0_0 = arith.constant 0 : index
    %0 = vector.load %arg1[%c0, %c0_0] : memref<8x128xi32, #tpu.memory_space<vmem>>, vector<8x128xi32>
    %1 = tpu.transpose %0, [1, 0] : vector<8x128xi32> -> vector<128x8xi32>
    %c0_i32 = arith.constant 0 : i32
    %2 = vector.broadcast %c0_i32 : i32 to vector<128x8xi32>
    %3 = arith.cmpi sge, %1, %2 : vector<128x8xi32>
    %c16_i32 = arith.constant 16 : i32
    %4 = vector.broadcast %c16_i32 : i32 to vector<128x8xi32>
    %5 = arith.cmpi slt, %1, %4 : vector<128x8xi32>
    %6 = arith.andi %3, %5 : vector<128x8xi1>
    %c-65_i32 = arith.constant -65 : i32
    %7 = vector.broadcast %c-65_i32 : i32 to vector<128x8xi32>
    %8 = arith.select %6, %1, %7 : vector<128x8xi1>, vector<128x8xi32>
    %9 = tpu.iota {dimensions = array<i32: 1>} : vector<128x64xi32>
    %cst = arith.constant 0.000000e+00 : f32
    %10 = vector.broadcast %cst : f32 to vector<128x64xf32>
    %11 = vector.extract_strided_slice %8 {offsets = [0, 0], sizes = [128, 1], strides = [1, 1]} : vector<128x8xi32> to vector<128x1xi32>
    %c0_i32_1 = arith.constant 0 : i32
    %12 = vector.broadcast %c0_i32_1 : i32 to vector<128x1xi32>
    %13 = arith.addi %11, %12 : vector<128x1xi32>
    %14 = vector.broadcast %13 : vector<128x1xi32> to vector<128x64xi32>
    %15 = arith.cmpi eq, %9, %14 : vector<128x64xi32>
    %16 = arith.extui %15 : vector<128x64xi1> to vector<128x64xi32>
    %17 = arith.sitofp %16 : vector<128x64xi32> to vector<128x64xf32>
    %18 = arith.addf %10, %17 : vector<128x64xf32>
    %19 = vector.extract_strided_slice %8 {offsets = [0, 1], sizes = [128, 1], strides = [1, 1]} : vector<128x8xi32> to vector<128x1xi32>
    %c16_i32_2 = arith.constant 16 : i32
    %20 = vector.broadcast %c16_i32_2 : i32 to vector<128x1xi32>
    %21 = arith.addi %19, %20 : vector<128x1xi32>
    %22 = vector.broadcast %21 : vector<128x1xi32> to vector<128x64xi32>
    %23 = arith.cmpi eq, %9, %22 : vector<128x64xi32>
    %24 = arith.extui %23 : vector<128x64xi1> to vector<128x64xi32>
    %25 = arith.sitofp %24 : vector<128x64xi32> to vector<128x64xf32>
    %26 = arith.addf %18, %25 : vector<128x64xf32>
    %27 = vector.extract_strided_slice %8 {offsets = [0, 2], sizes = [128, 1], strides = [1, 1]} : vector<128x8xi32> to vector<128x1xi32>
    %c32_i32 = arith.constant 32 : i32
    %28 = vector.broadcast %c32_i32 : i32 to vector<128x1xi32>
    %29 = arith.addi %27, %28 : vector<128x1xi32>
    %30 = vector.broadcast %29 : vector<128x1xi32> to vector<128x64xi32>
    %31 = arith.cmpi eq, %9, %30 : vector<128x64xi32>
    %32 = arith.extui %31 : vector<128x64xi1> to vector<128x64xi32>
    %33 = arith.sitofp %32 : vector<128x64xi32> to vector<128x64xf32>
    %34 = arith.addf %26, %33 : vector<128x64xf32>
    %35 = vector.extract_strided_slice %8 {offsets = [0, 3], sizes = [128, 1], strides = [1, 1]} : vector<128x8xi32> to vector<128x1xi32>
    %c48_i32 = arith.constant 48 : i32
    %36 = vector.broadcast %c48_i32 : i32 to vector<128x1xi32>
    %37 = arith.addi %35, %36 : vector<128x1xi32>
    %38 = vector.broadcast %37 : vector<128x1xi32> to vector<128x64xi32>
    %39 = arith.cmpi eq, %9, %38 : vector<128x64xi32>
    %40 = arith.extui %39 : vector<128x64xi1> to vector<128x64xi32>
    %41 = arith.sitofp %40 : vector<128x64xi32> to vector<128x64xf32>
    %42 = arith.addf %34, %41 : vector<128x64xf32>
    %c0_3 = arith.constant 0 : index
    %c0_4 = arith.constant 0 : index
    %43 = vector.load %arg2[%c0_3, %c0_4] : memref<64x128xf32, #tpu.memory_space<vmem>>, vector<64x128xf32>
    %cst_5 = arith.constant dense<0.000000e+00> : vector<128x128xf32>
    %44 = tpu.matmul %42, %43, %cst_5 {dimension_numbers = #tpu.dot_dimension_numbers<[1], [0], [0], [1], [0, 0, 1, 1], [], []>} : vector<128x64xf32>, vector<64x128xf32>, vector<128x128xf32> -> vector<128x128xf32>
    %c0_6 = arith.constant 0 : index
    %c0_7 = arith.constant 0 : index
    %45 = vector.load %arg3[%c0_6, %c0_7] : memref<128x128xf32, #tpu.memory_space<vmem>>, vector<128x128xf32>
    tpu.vector_store %arg3[%c0_6, %c0_7], %44 {strides = array<i32>} : memref<128x128xf32, #tpu.memory_space<vmem>>, vector<128x128xf32>,
    return
  }
  func.func @transform_0(%arg0: i32) -> (i32, i32) {
    %c0_i32 = arith.constant 0 : i32
    %c0_i32_0 = arith.constant 0 : i32
    return %c0_i32, %arg0 : i32, i32
  }
  func.func @transform_1(%arg0: i32) -> (i32, i32) {
    %c0_i32 = arith.constant 0 : i32
    %c0_i32_0 = arith.constant 0 : i32
    %c0_i32_1 = arith.constant 0 : i32
    return %c0_i32, %c0_i32_0 : i32, i32
  }
  func.func @transform_2(%arg0: i32) -> (i32, i32) {
    %c0_i32 = arith.constant 0 : i32
    %c0_i32_0 = arith.constant 0 : i32
    return %arg0, %c0_i32 : i32, i32
  }
}

</mosaic_0001>

<bundles_post_ra>
// kernel: tpu_custom_call.1
= control target key start
LH: loop header
LB: loop body
LE: loop exit
PB: predicated region body
PF: predicated region fallthrough
CT: control target
= control target key end

     0   :  { %7 = vsyncpa [#allocation3], 0  ;;  %s1546_s0 = inlined_call_operand.hbm [shape: s32[8,128], index: 0, kind: input, shape index: {}]   ;;  %s1547_s1 = inlined_call_operand.hbm [shape: f32[64,128], index: 1, kind: input, shape index: {}]   ;;  %s1548_s2 = inlined_call_operand.hbm [shape: f32[128,128], index: 2, kind: output, shape index: {}]  }
   0x1   :  { %8 = vsyncpa [#allocation6], 0 }
   0x2   :  { %9 = vsyncpa [#allocation4], 0  ;;  %s1166_s9 = smov [#allocation2]   ;;  %s1167_s11 = smov [#allocation5]  }
   0x3   :  { %s16_s10 = sshll.u32 %s1166_s9, 4  ;;  %s25_s12 = sshll.u32 %s1167_s11, 4  ;;  %s17_s10 = int_to_ptr.vmem [resolvable:$true] %s16_s10  ;;  %s1191_s12 = int_to_ptr.vmem [resolvable:$true] %s25_s12 }
   0x4   :  { %s1094_s15 = scalar_lea.hbm %s1546_s0, 128 }
   0x5   :  { %p1095_p0 = scmp.ne.s32.totalorder %s1546_s0, %s1094_s15  ;;  %p1098_p1 = scmp.lt.u32.totalorder %s1094_s15, %s1546_s0 }
   0x7   :  { %p1100_p2 = pnand %p1098_p1, %p1095_p0 }
   0x9   :  { %1103 = shalt.err (!%p1100_p2)
}
   0xa   :  { %s1104_s20 = scalar_lea.vmem %s17_s10, 128  ;;  %p1109_p4 = scmp.lt.s32.totalorder %s17_s10, %s17_s10 }
   0xb   :  { %p1105_p3 = scmp.ne.s32.totalorder %s17_s10, %s1104_s20  ;;  %p1110_p5 = scmp.lt.s32.totalorder %s1104_s20, %s1104_s20 }
   0xd   :  { %p1111_p6 = por %p1110_p5, %p1109_p4 }
   0xf   :  { %p1112_p7 = pnand %p1111_p6, %p1105_p3 }
  0x11   :  { %1115 = shalt.err (!%p1112_p7)
}
  0x12   :  { %19 = dma.hbm_to_vmem [thread:$0]  %s1546_s0, 128, %s17_s10, [#allocation3]  }
  0x13   :  { %s1116_s25 = scalar_lea.hbm %s1547_s1, 1024 }
  0x14   :  { %p1117_p8 = scmp.ne.s32.totalorder %s1547_s1, %s1116_s25  ;;  %p1120_p9 = scmp.lt.u32.totalorder %s1116_s25, %s1547_s1 }
  0x16   :  { %p1122_p10 = pnand %p1120_p9, %p1117_p8 }
  0x18   :  { %1125 = shalt.err (!%p1122_p10)
}
  0x19   :  { %s1126_s30 = scalar_lea.vmem %s1191_s12, 1024  ;;  %p1131_p12 = scmp.lt.s32.totalorder %s1191_s12, %s1191_s12 }
  0x1a   :  { %p1127_p11 = scmp.ne.s32.totalorder %s1191_s12, %s1126_s30  ;;  %p1132_p13 = scmp.lt.s32.totalorder %s1126_s30, %s1126_s30 }
  0x1c   :  { %p1133_p0 = por %p1132_p13, %p1131_p12 }
  0x1e   :  { %p1134_p1 = pnand %p1133_p0, %p1127_p11 }
  0x20   :  { %1137 = shalt.err (!%p1134_p1)
}
  0x21   :  { %s1168_s0 = smov 128   ;;  %s1169_s3 = smov 8  }
  0x22   :  { %31 = dma.hbm_to_vmem [thread:$0]  %s1547_s1, 1024, %s1191_s12, [#allocation6], %s1168_s0, %s1168_s0, %s1169_s3  }
  0x23   :  { %1160 = dma.done.wait [#allocation3], 128  }
  0x24   :  { %1161 = vsyncadd [#allocation3], 4294967168 }
  0x25   :  { %1162 = dma.done.wait [#allocation6], 1024  }
  0x26   :  { %1163 = vsyncadd [#allocation6], 4294966272  ;;  %v38_v0 = vld [vmem:[#allocation2] sm:$0xff]  ;;  %v1170_v1 = vmov 1   ;;  %v1171_v8 = vmov 2   ;;  %v1172_v11 = vmov 3  }
  0x27   :  { %39 = vxpose.xlu0.b32.start.end [1/1] (short) %v38_v0, 128  ;;  %1047 = vset.pattern.permute.xlu1 %v1170_v1  ;;  %v1173_v14 = vmov 0   ;;  %v633_v18 = vld [vmem:[#allocation5] sm:$0xff]  ;;  %v634_v19 = vld [vmem:[#allocation5 + $0x8] sm:$0xff]  ;;  %v635_v25 = vld [vmem:[#allocation5 + $0x10] sm:$0xff]  ;;  %s1175_s1 = smov [#allocation7]  }
  0x28   :  { %v1013_v20 = vpack.c.bf16 %v634_v19, %v633_v18  ;;  %v636_v26 = vld [vmem:[#allocation5 + $0x18] sm:$0xff]  ;;  %v637_v30 = vld [vmem:[#allocation5 + $0x20] sm:$0xff]  ;;  %v638_v31 = vld [vmem:[#allocation5 + $0x28] sm:$0xff]  ;;  %s856_s6 = sshll.u32 %s1175_s1, 4  ;;  %s857_s6 = int_to_ptr.vmem [resolvable:$true] %s856_s6 }
  0x29   :  { %v1017_v27 = vpack.c.bf16 %v636_v26, %v635_v25  ;;  %v1021_v32 = vpack.c.bf16 %v638_v31, %v637_v30  ;;  %v639_v34 = vld [vmem:[#allocation5 + $0x30] sm:$0xff]  ;;  %v640_v35 = vld [vmem:[#allocation5 + $0x38] sm:$0xff]  ;;  %s1138_s7 = scalar_lea.vmem %s857_s6, 2048  ;;  %p1143_p3 = scmp.lt.s32.totalorder %s857_s6, %s857_s6 }
  0x2a   :  { %1014 = vmatprep.subr.bf16.mxu0 %v1013_v20  ;;  %1029 = vmatprep.subr.bf16.mxu1 %v1013_v20  ;;  %v1025_v37 = vpack.c.bf16 %v640_v35, %v639_v34  ;;  %p1139_p2 = scmp.ne.s32.totalorder %s857_s6, %s1138_s7  ;;  %p1144_p4 = scmp.lt.s32.totalorder %s1138_s7, %s1138_s7 }
  0x2b   :  { %1016 = vmatpush3.bf16.msra.mxu0 %v1013_v20  ;;  %1033 = vmatpush3.bf16.msra.mxu1 %v1013_v20 }
  0x2c   :  { %1018 = vmatprep.subr.bf16.mxu0 %v1017_v27  ;;  %1030 = vmatprep.subr.bf16.mxu1 %v1017_v27  ;;  %p1145_p5 = por %p1144_p4, %p1143_p3 }
  0x2e   :  { %p1146_p6 = pnand %p1145_p5, %p1139_p2 }
  0x2f   :  { %1020 = vmatpush3.bf16.msra.mxu0 %v1017_v27  ;;  %1034 = vmatpush3.bf16.msra.mxu1 %v1017_v27 }
  0x30   :  { %1022 = vmatprep.subr.bf16.mxu0 %v1021_v32  ;;  %1031 = vmatprep.subr.bf16.mxu1 %v1021_v32 }
  0x33   :  { %1024 = vmatpush3.bf16.msra.mxu0 %v1021_v32  ;;  %1035 = vmatpush3.bf16.msra.mxu1 %v1021_v32 }
  0x34   :  { %1026 = vmatprep.subr.bf16.mxu0 %v1025_v37  ;;  %1032 = vmatprep.subr.bf16.mxu1 %v1025_v37 }
  0x37   :  { %1028 = vmatpush3.bf16.msra.mxu0 %v1025_v37  ;;  %1036 = vmatpush3.bf16.msra.mxu1 %v1025_v37 }
  0x50   :  { %1061 = vset.pattern.permute.xlu0 %v1170_v1 }
  0xa7   :  { %v55_v2 = vpop.trf.xlu0 }
  0xa8   :  { %vm71_vm0 = vcmp.ge.s32.totalorder %v55_v2, 0  ;;  %vm87_vm1 = vcmp.lt.s32.totalorder %v55_v2, 16 }
  0xa9   :  { %vm103_vm2 = vmand %vm71_vm0, %vm87_vm1 }
  0xaa   :  { %v119_v3 = vsel %vm103_vm2, %v55_v2, 4294967231 }
  0xab   :  { %v56_v4 = vpop.trf.xlu0  ;;  %v249_v5 = vadd.s32 16, %v119_v3  ;;  %v377_v7 = vadd.s32 32, %v119_v3  ;;  %v505_v10 = vadd.s32 48, %v119_v3 }
  0xac   :  { %vm72_vm3 = vcmp.ge.s32.totalorder %v56_v4, 0  ;;  %vm88_vm4 = vcmp.lt.s32.totalorder %v56_v4, 16 }
  0xad   :  { %266 = vperm.xlu1 %1047, %v249_v5   ;;  %vm104_vm7 = vmand %vm72_vm3, %vm88_vm4 }
  0xae   :  { %v120_v16 = vsel %vm104_vm7, %v56_v4, 4294967231 }
  0xaf   :  { %v1227_v6 = vpop.trf.xlu0  ;;  %v250_v23 = vadd.s32 16, %v120_v16  ;;  %v378_v29 = vadd.s32 32, %v120_v16  ;;  %v506_v36 = vadd.s32 48, %v120_v16 }
  0xb0   :  { %vm73_vm12 = vcmp.ge.s32.totalorder %v1227_v6, 0  ;;  %vm89_vm13 = vcmp.lt.s32.totalorder %v1227_v6, 16 }
  0xb1   :  { %1048 = vset.pattern.permute.xlu1 %v1171_v8  ;;  %vm105_vm14 = vmand %vm73_vm12, %vm89_vm13 }
  0xb2   :  { %394 = vperm.xlu1 %1048, %v377_v7   ;;  %v121_v40 = vsel %vm105_vm14, %v1227_v6, 4294967231 }
  0xb3   :  { %v1230_v9 = vpop.trf.xlu0  ;;  %v251_v42 = vadd.s32 16, %v121_v40  ;;  %v379_v44 = vadd.s32 32, %v121_v40  ;;  %v507_v46 = vadd.s32 48, %v121_v40 }
  0xb4   :  { %vm74_vm15 = vcmp.ge.s32.totalorder %v1230_v9, 0  ;;  %vm90_vm0 = vcmp.lt.s32.totalorder %v1230_v9, 16 }
  0xb5   :  { %vm106_vm3 = vmand %vm74_vm15, %vm90_vm0 }
  0xb6   :  { %1049 = vset.pattern.permute.xlu1 %v1172_v11  ;;  %v122_v50 = vsel %vm106_vm3, %v1230_v9, 4294967231 }
  0xb7   :  { %522 = vperm.xlu1 %1049, %v505_v10   ;;  %v59_v12 = vpop.trf.xlu0  ;;  %v252_v52 = vadd.s32 16, %v122_v50  ;;  %v380_v54 = vadd.s32 32, %v122_v50  ;;  %v508_v60 = vadd.s32 48, %v122_v50 }
  0xb8   :  { %vm75_vm5 = vcmp.ge.s32.totalorder %v59_v12, 0  ;;  %vm91_vm6 = vcmp.lt.s32.totalorder %v59_v12, 16 }
  0xb9   :  { %vm107_vm8 = vmand %vm75_vm5, %vm91_vm6 }
  0xba   :  { %v1233_v13 = vsel %vm107_vm8, %v59_v12, 4294967231 }
  0xbb   :  { %1050 = vset.pattern.permute.xlu1 %v1173_v14  ;;  %v60_v15 = vpop.trf.xlu0  ;;  %v253_v17 = vadd.s32 16, %v1233_v13  ;;  %v509_v61 = vadd.s32 48, %v1233_v13 }
  0xbc   :  { %vm76_vm9 = vcmp.ge.s32.totalorder %v60_v15, 0  ;;  %vm92_vm10 = vcmp.lt.s32.totalorder %v60_v15, 16  ;;  %141 = vperm.xlu1 %1050, %v120_v16  }
  0xbd   :  { %vm108_vm11 = vmand %vm76_vm9, %vm92_vm10  ;;  %278 = vperm.xlu0 %1061, %v253_v17  }
  0xbe   :  { %v1237_v21 = vsel %vm108_vm11, %v60_v15, 4294967231 }
  0xbf   :  { %v1239_v22 = vpop.trf.xlu0  ;;  %v254_v24 = vadd.s32 16, %v1237_v21  ;;  %v382_v53 = vadd.s32 32, %v1237_v21  ;;  %v510_v63 = vadd.s32 48, %v1237_v21 }
  0xc0   :  { %1051 = vset.pattern.permute.xlu1 %v1170_v1 }
  0xc1   :  { %269 = vperm.xlu1 %1051, %v250_v23   ;;  %281 = vperm.xlu0 %1061, %v254_v24  }
  0xc3   :  { %v1243_v28 = vpop.trf.xlu0 }
  0xc5   :  { %1052 = vset.pattern.permute.xlu1 %v1171_v8  ;;  %1063 = vset.pattern.permute.xlu0 %v1173_v14 }
  0xc6   :  { %397 = vperm.xlu1 %1052, %v378_v29   ;;  %138 = vperm.xlu0 %1063, %v119_v3  }
  0xc7   :  { %v1247_v33 = vpop.trf.xlu0 }
  0xc8   :  { %vm79_vm14 = vcmp.ge.s32.totalorder %v1247_v33, 0  ;;  %vm95_vm15 = vcmp.lt.s32.totalorder %v1247_v33, 16 }
  0xc9   :  { %vm111_vm0 = vmand %vm79_vm14, %vm95_vm15 }
  0xca   :  { %1053 = vset.pattern.permute.xlu1 %v1172_v11  ;;  %150 = vperm.xlu0 %1063, %v1233_v13   ;;  %v127_v62 = vsel %vm111_vm0, %v1247_v33, 4294967231  ;;  %v1174_v33 = vmov 0.0  }
  0xcb   :  { %525 = vperm.xlu1 %1053, %v506_v36   ;;  %v1253_v38 = vpop.trf.xlu0  ;;  %v257_v2 = vadd.s32 16, %v127_v62  ;;  %v385_v4 = vadd.s32 32, %v127_v62  ;;  %v513_v6 = vadd.s32 48, %v127_v62 }
  0xcf   :  { %1054 = vset.pattern.permute.xlu1 %v1173_v14  ;;  %v65_v39 = vpop.trf.xlu0 }
  0xd0   :  { %144 = vperm.xlu1 %1054, %v121_v40   ;;  %vm81_vm8 = vcmp.ge.s32.totalorder %v65_v39, 0  ;;  %vm97_vm9 = vcmp.lt.s32.totalorder %v65_v39, 16 }
  0xd1   :  { %vm113_vm10 = vmand %vm81_vm8, %vm97_vm9 }
  0xd2   :  { %v129_v56 = vsel %vm113_vm10, %v65_v39, 4294967231 }
  0xd3   :  { %v66_v41 = vpop.trf.xlu0  ;;  %v515_v57 = vadd.s32 48, %v129_v56  ;;  %v259_v15 = vadd.s32 16, %v129_v56  ;;  %v387_v17 = vadd.s32 32, %v129_v56 }
  0xd4   :  { %1055 = vset.pattern.permute.xlu1 %v1170_v1  ;;  %vm82_vm11 = vcmp.ge.s32.totalorder %v66_v41, 0  ;;  %vm98_vm12 = vcmp.lt.s32.totalorder %v66_v41, 16 }
  0xd5   :  { %272 = vperm.xlu1 %1055, %v251_v42   ;;  %vm114_vm13 = vmand %vm82_vm11, %vm98_vm12 }
  0xd6   :  { %v1279_v58 = vsel %vm114_vm13, %v66_v41, 4294967231 }
  0xd7   :  { %v1258_v43 = vpop.trf.xlu0  ;;  %v516_v59 = vadd.s32 48, %v1279_v58  ;;  %v260_v20 = vadd.s32 16, %v1279_v58  ;;  %v388_v24 = vadd.s32 32, %v1279_v58 }
  0xd8   :  { %vm99_vm8 = vcmp.lt.s32.totalorder %v1258_v43, 16 }
  0xd9   :  { %1056 = vset.pattern.permute.xlu1 %v1171_v8 }
  0xda   :  { %400 = vperm.xlu1 %1056, %v379_v44  }
  0xdb   :  { %v1261_v45 = vpop.trf.xlu0 }
  0xdc   :  { %vm84_vm12 = vcmp.ge.s32.totalorder %v1261_v45, 0  ;;  %vm100_vm13 = vcmp.lt.s32.totalorder %v1261_v45, 16 }
  0xde   :  { %1057 = vset.pattern.permute.xlu1 %v1172_v11 }
  0xdf   :  { %528 = vperm.xlu1 %1057, %v507_v46   ;;  %v69_v47 = vpop.trf.xlu0 }
  0xe0   :  { %vm85_vm1 = vcmp.ge.s32.totalorder %v69_v47, 0  ;;  %vm101_vm2 = vcmp.lt.s32.totalorder %v69_v47, 16 }
  0xe1   :  { %vm117_vm4 = vmand %vm85_vm1, %vm101_vm2  ;;  %vm77_vm1 = vcmp.ge.s32.totalorder %v1239_v22, 0  ;;  %vm93_vm2 = vcmp.lt.s32.totalorder %v1239_v22, 16 }
  0xe2   :  { %v1266_v48 = vsel %vm117_vm4, %v69_v47, 4294967231  ;;  %vm109_vm3 = vmand %vm77_vm1, %vm93_vm2  ;;  %vm80_vm4 = vcmp.ge.s32.totalorder %v1253_v38, 0 }
  0xe3   :  { %1058 = vset.pattern.permute.xlu1 %v1173_v14  ;;  %180 = vperm.xlu0 %1063, %v1266_v48   ;;  %v70_v49 = vpop.trf.xlu0  ;;  %v391_v55 = vadd.s32 32, %v1266_v48  ;;  %v1295_v0 = vsel %vm109_vm3, %v1239_v22, 4294967231  ;;  %v135_v22 = vlaneseq  ;;  %vm116_vm3 = vmand %vm84_vm12, %vm100_vm13 }
  0xe4   :  { %vm86_vm5 = vcmp.ge.s32.totalorder %v70_v49, 0  ;;  %vm102_vm6 = vcmp.lt.s32.totalorder %v70_v49, 16  ;;  %147 = vperm.xlu1 %1058, %v122_v50   ;;  %v511_v3 = vadd.s32 48, %v1295_v0 }
  0xe5   :  { %vm118_vm7 = vmand %vm86_vm5, %vm102_vm6  ;;  %vm96_vm5 = vcmp.lt.s32.totalorder %v1253_v38, 16  ;;  %v1322_v25 = vand.u32 127, %v135_v22 }
  0xe6   :  { %v1271_v51 = vsel %vm118_vm7, %v70_v49, 4294967231  ;;  %vm112_vm6 = vmand %vm80_vm4, %vm96_vm5  ;;  %vm83_vm7 = vcmp.ge.s32.totalorder %v1258_v43, 0  ;;  %vm641_vm5 = vcmask 523264   ;;  %v1357_v49 = vsel %vm116_vm3, %v1261_v45, 4294967231 }
  0xe7   :  { %183 = vperm.xlu0 %1063, %v1271_v51   ;;  %v520_v5 = vadd.s32 48, %v1271_v51  ;;  %v128_v7 = vsel %vm112_vm6, %v1253_v38, 4294967231  ;;  %vm115_vm9 = vmand %vm83_vm7, %vm99_vm8 }
  0xe8   :  { %1059 = vset.pattern.permute.xlu1 %v1170_v1  ;;  %v258_v9 = vadd.s32 16, %v128_v7  ;;  %v386_v10 = vadd.s32 32, %v128_v7  ;;  %v514_v12 = vadd.s32 48, %v128_v7  ;;  %v1328_v29 = vsel %vm115_vm9, %v1258_v43, 4294967231 }
  0xe9   :  { %275 = vperm.xlu1 %1059, %v252_v52   ;;  %v261_v32 = vadd.s32 16, %v1328_v29 }
  0xeb   :  { %1088 = vset.pattern.permute.xlu0 %v1171_v8 }
  0xec   :  { %409 = vperm.xlu0 %1088, %v382_v53  }
  0xed   :  { %1060 = vset.pattern.permute.xlu1 %v1171_v8 }
  0xee   :  { %403 = vperm.xlu1 %1060, %v380_v54   ;;  %v262_v54 = vadd.s32 16, %v1357_v49 }
  0xf0   :  { %436 = vperm.xlu0 %1088, %v391_v55  }
  0xf2   :  { %1062 = vset.pattern.permute.xlu1 %v1173_v14 }
  0xf3   :  { %153 = vperm.xlu1 %1062, %v1237_v21  }
  0xf4   :  { %1092 = vset.pattern.permute.xlu0 %v1172_v11 }
  0xf5   :  { %552 = vperm.xlu0 %1092, %v515_v57   ;;  %v389_v57 = vadd.s32 32, %v1328_v29 }
  0xf7   :  { %1064 = vset.pattern.permute.xlu1 %v1172_v11 }
  0xf8   :  { %531 = vperm.xlu1 %1064, %v508_v60  }
  0xf9   :  { %555 = vperm.xlu0 %1092, %v516_v59  }
  0xfc   :  { %1065 = vset.pattern.permute.xlu1 %v1173_v14 }
  0xfd   :  { %162 = vperm.xlu1 %1065, %v127_v62   ;;  %534 = vperm.xlu0 %1092, %v509_v61   ;;  %v390_v61 = vadd.s32 32, %v1357_v49 }
 0x101   :  { %1066 = vset.pattern.permute.xlu1 %v1170_v1  ;;  %537 = vperm.xlu0 %1092, %v510_v63  }
 0x102   :  { %290 = vperm.xlu1 %1066, %v257_v2  }
 0x105   :  { %540 = vperm.xlu0 %1092, %v511_v3  }
 0x106   :  { %1067 = vset.pattern.permute.xlu1 %v1171_v8 }
 0x107   :  { %418 = vperm.xlu1 %1067, %v385_v4  }
 0x109   :  { %567 = vperm.xlu0 %1092, %v520_v5   ;;  %v255_v5 = vadd.s32 16, %v1295_v0 }
 0x10b   :  { %1068 = vset.pattern.permute.xlu1 %v1172_v11 }
 0x10c   :  { %546 = vperm.xlu1 %1068, %v513_v6  }
 0x110   :  { %1069 = vset.pattern.permute.xlu1 %v1173_v14 }
 0x111   :  { %165 = vperm.xlu1 %1069, %v128_v7   ;;  %v263_v7 = vadd.s32 16, %v1266_v48 }
 0x115   :  { %1070 = vset.pattern.permute.xlu1 %v1170_v1 }
 0x116   :  { %293 = vperm.xlu1 %1070, %v258_v9  }
 0x11a   :  { %1071 = vset.pattern.permute.xlu1 %v1171_v8 }
 0x11b   :  { %421 = vperm.xlu1 %1071, %v386_v10   ;;  %v517_v10 = vadd.s32 48, %v1328_v29 }
 0x11f   :  { %1072 = vset.pattern.permute.xlu1 %v1172_v11 }
 0x120   :  { %549 = vperm.xlu1 %1072, %v514_v12  }
 0x124   :  { %1073 = vset.pattern.permute.xlu1 %v1173_v14 }
 0x125   :  { %168 = vperm.xlu1 %1073, %v129_v56   ;;  %v381_v56 = vadd.s32 32, %v1233_v13 }
 0x129   :  { %1074 = vset.pattern.permute.xlu1 %v1170_v1 }
 0x12a   :  { %296 = vperm.xlu1 %1074, %v259_v15  }
 0x12c   :  { %v267_v16 = vpop.permute.xlu1 %266 }
 0x12d   :  { %vm313_vm11 = vcmp.eq.s32.totalorder %v1322_v25, %v267_v16 }
 0x12e   :  { %1075 = vset.pattern.permute.xlu1 %v1171_v8  ;;  %v885_v35 = vsel %vm313_vm11, 1.0, %v1174_v33  ;;  %vm94_vm11 = vcmp.lt.s32.totalorder %v1243_v28, 16 }
 0x12f   :  { %424 = vperm.xlu1 %1075, %v387_v17  }
 0x131   :  { %v395_v18 = vpop.permute.xlu1 %394 }
 0x132   :  { %vm441_vm15 = vcmp.eq.s32.totalorder %v1322_v25, %v395_v18 }
 0x133   :  { %1076 = vset.pattern.permute.xlu1 %v1173_v14  ;;  %v901_v40 = vsel %vm441_vm15, 1.0, %v1174_v33 }
 0x134   :  { %171 = vperm.xlu1 %1076, %v1279_v58  }
 0x136   :  { %v523_v19 = vpop.permute.xlu1 %522 }
 0x137   :  { %vm569_vm2 = vcmp.eq.s32.totalorder %v1322_v25, %v523_v19 }
 0x138   :  { %1077 = vset.pattern.permute.xlu1 %v1170_v1  ;;  %v917_v44 = vsel %vm569_vm2, 1.0, %v1174_v33 }
 0x139   :  { %299 = vperm.xlu1 %1077, %v260_v20  }
 0x13b   :  { %v142_v21 = vpop.permute.xlu1 %141 }
 0x13c   :  { %v1318_v23 = vpop.permute.xlu0 %278  ;;  %vm186_vm14 = vcmp.eq.s32.totalorder %v1322_v25, %v142_v21 }
 0x13d   :  { %1078 = vset.pattern.permute.xlu1 %v1171_v8  ;;  %v870_v37 = vsel %vm186_vm14, 1.0, %v1174_v33 }
 0x13e   :  { %427 = vperm.xlu1 %1078, %v388_v24  }
 0x140   :  { %v270_v26 = vpop.permute.xlu1 %269  ;;  %v1324_v27 = vpop.permute.xlu0 %281 }
 0x141   :  { %vm314_vm10 = vcmp.eq.s32.totalorder %v1322_v25, %v270_v26  ;;  %vm318_vm13 = vcmp.eq.s32.totalorder %v1322_v25, %v1324_v27 }
 0x142   :  { %1079 = vset.pattern.permute.xlu1 %v1173_v14  ;;  %v886_v34 = vsel %vm314_vm10, 1.0, %v1174_v33  ;;  %vm78_vm10 = vcmp.ge.s32.totalorder %v1243_v28, 0  ;;  %v890_v16 = vsel %vm318_vm13, 1.0, %v1174_v33 }
 0x143   :  { %174 = vperm.xlu1 %1079, %v1328_v29   ;;  %v362_v41 = vadd.f32 %v886_v34, %v870_v37 }
 0x145   :  { %v398_v30 = vpop.permute.xlu1 %397  ;;  %v139_v31 = vpop.permute.xlu0 %138 }
 0x146   :  { %vm442_vm0 = vcmp.eq.s32.totalorder %v1322_v25, %v398_v30  ;;  %vm185_vm1 = vcmp.eq.s32.totalorder %v1322_v25, %v139_v31 }
 0x147   :  { %v869_v36 = vsel %vm185_vm1, 1.0, %v1174_v33  ;;  %1080 = vset.pattern.permute.xlu1 %v1170_v1  ;;  %v902_v38 = vsel %vm442_vm0, 1.0, %v1174_v33  ;;  %vm110_vm1 = vmand %vm78_vm10, %vm94_vm11 }
 0x148   :  { %v361_v39 = vadd.f32 %v885_v35, %v869_v36  ;;  %302 = vperm.xlu1 %1080, %v261_v32   ;;  %v490_v46 = vadd.f32 %v902_v38, %v362_v41  ;;  %v126_v22 = vsel %vm110_vm1, %v1243_v28, 4294967231  ;;  %v264_v32 = vadd.s32 16, %v1271_v51 }
 0x149   :  { %v256_v30 = vadd.s32 16, %v126_v22  ;;  %v518_v28 = vadd.s32 48, %v1357_v49  ;;  %v383_v35 = vadd.s32 32, %v1295_v0  ;;  %v384_v41 = vadd.s32 32, %v126_v22 }
 0x14a   :  { %v526_v42 = vpop.permute.xlu1 %525  ;;  %v489_v43 = vadd.f32 %v901_v40, %v361_v39 }
 0x14b   :  { %vm570_vm4 = vcmp.eq.s32.totalorder %v1322_v25, %v526_v42 }
 0x14c   :  { %v918_v47 = vsel %vm570_vm4, 1.0, %v1174_v33  ;;  %1081 = vset.pattern.permute.xlu1 %v1173_v14  ;;  %v617_v50 = vadd.f32 %v917_v44, %v489_v43  ;;  %v1418_v44 = vpop.permute.xlu0 %150 }
 0x14d   :  { %v618_v52 = vadd.f32 %v918_v47, %v490_v46  ;;  %177 = vperm.xlu1 %1081, %v1357_v49   ;;  %v392_v46 = vadd.s32 32, %v1271_v51  ;;  %v519_v47 = vadd.s32 48, %v1266_v48 }
 0x14e   :  { %989 = vmatprep.mubr.msk.f32.mxu0 %vm641_vm5, %v617_v50  ;;  %v512_v50 = vadd.s32 48, %v126_v22 }
 0x14f   :  { %v145_v53 = vpop.permute.xlu1 %144  ;;  %990 = vmatmul.mubr.msk.f32.vlgmr.msra.gmra.mrb[0].mxu0 %vm641_vm5, %v618_v52 }
 0x150   :  { %vm187_vm7 = vcmp.eq.s32.totalorder %v1322_v25, %v145_v53 }
 0x151   :  { %1082 = vset.pattern.permute.xlu1 %v1170_v1  ;;  %v871_v59 = vsel %vm187_vm7, 1.0, %v1174_v33 }
 0x152   :  { %305 = vperm.xlu1 %1082, %v262_v54  }
 0x154   :  { %v273_v55 = vpop.permute.xlu1 %272 }
 0x155   :  { %vm315_vm6 = vcmp.eq.s32.totalorder %v1322_v25, %v273_v55 }
 0x156   :  { %1083 = vset.pattern.permute.xlu1 %v1171_v8  ;;  %v887_v58 = vsel %vm315_vm6, 1.0, %v1174_v33 }
 0x157   :  { %406 = vperm.xlu1 %1083, %v381_v56   ;;  %v363_v13 = vadd.f32 %v887_v58, %v871_v59 }
 0x159   :  { %v401_v45 = vpop.permute.xlu1 %400 }
 0x15a   :  { %vm443_vm8 = vcmp.eq.s32.totalorder %v1322_v25, %v401_v45 }
 0x15b   :  { %430 = vperm.xlu1 %1083, %v389_v57   ;;  %v903_v60 = vsel %vm443_vm8, 1.0, %v1174_v33 }
 0x15c   :  { %v491_v63 = vadd.f32 %v903_v60, %v363_v13 }
 0x15e   :  { %v529_v62 = vpop.permute.xlu1 %528 }
 0x15f   :  { %vm571_vm9 = vcmp.eq.s32.totalorder %v1322_v25, %v529_v62  ;;  %433 = vperm.xlu1 %1083, %v390_v61  }
 0x160   :  { %v919_v2 = vsel %vm571_vm9, 1.0, %v1174_v33 }
 0x161   :  { %v619_v3 = vadd.f32 %v919_v2, %v491_v63 }
 0x162   :  { %v1423_v49 = vpop.permute.xlu0 %180 }
 0x163   :  { %v148_v4 = vpop.permute.xlu1 %147  ;;  %1084 = vset.pattern.permute.xlu1 %v1173_v14  ;;  %992 = vmatprep.mubr.msk.f32.mxu0 %vm641_vm5, %v619_v3 }
 0x164   :  { %156 = vperm.xlu1 %1084, %v1295_v0   ;;  %vm188_vm14 = vcmp.eq.s32.totalorder %v1322_v25, %v148_v4 }
 0x165   :  { %v872_v18 = vsel %vm188_vm14, 1.0, %v1174_v33 }
 0x166   :  { %v1430_v51 = vpop.permute.xlu0 %183 }
 0x168   :  { %v276_v6 = vpop.permute.xlu1 %275  ;;  %1085 = vset.pattern.permute.xlu1 %v1170_v1 }
 0x169   :  { %284 = vperm.xlu1 %1085, %v255_v5   ;;  %vm316_vm12 = vcmp.eq.s32.totalorder %v1322_v25, %v276_v6 }
 0x16a   :  { %v888_v15 = vsel %vm316_vm12, 1.0, %v1174_v33 }
 0x16b   :  { %v364_v21 = vadd.f32 %v888_v15, %v872_v18  ;;  %v410_v57 = vpop.permute.xlu0 %409 }
 0x16d   :  { %v404_v9 = vpop.permute.xlu1 %403  ;;  %308 = vperm.xlu1 %1085, %v263_v7  }
 0x16e   :  { %vm444_vm15 = vcmp.eq.s32.totalorder %v1322_v25, %v404_v9 }
 0x16f   :  { %v904_v19 = vsel %vm444_vm15, 1.0, %v1174_v33  ;;  %v1437_v60 = vpop.permute.xlu0 %436 }
 0x170   :  { %v492_v26 = vadd.f32 %v904_v19, %v364_v21 }
 0x171   :  { %1086 = vset.pattern.permute.xlu1 %v1172_v11 }
 0x172   :  { %v154_v12 = vpop.permute.xlu1 %153  ;;  %558 = vperm.xlu1 %1086, %v517_v10  }
 0x173   :  { %vm190_vm0 = vcmp.eq.s32.totalorder %v1322_v25, %v154_v12 }
 0x174   :  { %v874_v17 = vsel %vm190_vm0, 1.0, %v1174_v33  ;;  %v553_v62 = vpop.permute.xlu0 %552 }
 0x175   :  { %v1397_v20 = vadd.f32 %v890_v16, %v874_v17  ;;  %vm579_vm14 = vcmp.eq.s32.totalorder %v1322_v25, %v553_v62 }
 0x176   :  { %1087 = vset.pattern.permute.xlu1 %v1173_v14  ;;  %v927_v6 = vsel %vm579_vm14, 1.0, %v1174_v33 }
 0x177   :  { %v532_v24 = vpop.permute.xlu1 %531  ;;  %159 = vperm.xlu1 %1087, %v126_v22  }
 0x178   :  { %vm572_vm2 = vcmp.eq.s32.totalorder %v1322_v25, %v532_v24  ;;  %v556_v15 = vpop.permute.xlu0 %555 }
 0x179   :  { %v920_v27 = vsel %vm572_vm2, 1.0, %v1174_v33  ;;  %vm580_vm2 = vcmp.eq.s32.totalorder %v1322_v25, %v556_v15 }
 0x17a   :  { %v620_v29 = vadd.f32 %v920_v27, %v492_v26  ;;  %v928_v22 = vsel %vm580_vm2, 1.0, %v1174_v33 }
 0x17b   :  { %1089 = vset.pattern.permute.xlu1 %v1170_v1 }
 0x17c   :  { %v163_v31 = vpop.permute.xlu1 %162  ;;  %287 = vperm.xlu1 %1089, %v256_v30   ;;  %993 = vmatmul.mubr.msk.f32.gmra.mrb[2].mxu0 %vm641_vm5, %v620_v29  ;;  %v535_v30 = vpop.permute.xlu0 %534 }
 0x17d   :  { %vm193_vm4 = vcmp.eq.s32.totalorder %v1322_v25, %v163_v31 }
 0x17e   :  { %v877_v36 = vsel %vm193_vm4, 1.0, %v1174_v33  ;;  %vm317_vm4 = vcmp.eq.s32.totalorder %v1322_v25, %v1318_v23 }
 0x180   :  { %311 = vperm.xlu1 %1089, %v264_v32   ;;  %v538_v32 = vpop.permute.xlu0 %537 }
 0x181   :  { %v291_v14 = vpop.permute.xlu1 %290 }
 0x182   :  { %vm321_vm3 = vcmp.eq.s32.totalorder %v1322_v25, %v291_v14  ;;  %v889_v14 = vsel %vm317_vm4, 1.0, %v1174_v33 }
 0x183   :  { %v893_v1 = vsel %vm321_vm3, 1.0, %v1174_v33 }
 0x184   :  { %1090 = vset.pattern.permute.xlu1 %v1172_v11  ;;  %v369_v38 = vadd.f32 %v893_v1, %v877_v36 }
 0x185   :  { %561 = vperm.xlu1 %1090, %v518_v28  }
 0x186   :  { %v419_v34 = vpop.permute.xlu1 %418 }
 0x187   :  { %vm449_vm6 = vcmp.eq.s32.totalorder %v1322_v25, %v419_v34 }
 0x188   :  { %v909_v37 = vsel %vm449_vm6, 1.0, %v1174_v33  ;;  %vm189_vm6 = vcmp.eq.s32.totalorder %v1322_v25, %v1418_v44 }
 0x189   :  { %1091 = vset.pattern.permute.xlu1 %v1171_v8  ;;  %v497_v40 = vadd.f32 %v909_v37, %v369_v38  ;;  %v873_v28 = vsel %vm189_vm6, 1.0, %v1174_v33 }
 0x18a   :  { %412 = vperm.xlu1 %1091, %v383_v35   ;;  %v365_v1 = vadd.f32 %v889_v14, %v873_v28 }
 0x18b   :  { %v547_v39 = vpop.permute.xlu1 %546 }
 0x18c   :  { %vm577_vm7 = vcmp.eq.s32.totalorder %v1322_v25, %v547_v39 }
 0x18d   :  { %v925_v42 = vsel %vm577_vm7, 1.0, %v1174_v33  ;;  %vm446_vm7 = vcmp.eq.s32.totalorder %v1322_v25, %v410_v57 }
 0x18e   :  { %415 = vperm.xlu1 %1091, %v384_v41   ;;  %v625_v43 = vadd.f32 %v925_v42, %v497_v40  ;;  %v906_v35 = vsel %vm446_vm7, 1.0, %v1174_v33 }
 0x18f   :  { %v494_v39 = vadd.f32 %v906_v35, %v1397_v20 }
 0x190   :  { %1001 = vmatprep.mubr.msk.f32.mxu1 %vm641_vm5, %v625_v43  ;;  %v166_v0 = vpop.permute.xlu1 %165 }
 0x191   :  { %vm194_vm9 = vcmp.eq.s32.totalorder %v1322_v25, %v166_v0 }
 0x192   :  { %439 = vperm.xlu1 %1091, %v392_v46   ;;  %v878_v48 = vsel %vm194_vm9, 1.0, %v1174_v33  ;;  %vm573_vm9 = vcmp.eq.s32.totalorder %v1322_v25, %v535_v30 }
 0x193   :  { %v921_v38 = vsel %vm573_vm9, 1.0, %v1174_v33 }
 0x195   :  { %v294_v8 = vpop.permute.xlu1 %293 }
 0x196   :  { %1093 = vset.pattern.permute.xlu1 %v1172_v11  ;;  %vm322_vm8 = vcmp.eq.s32.totalorder %v1322_v25, %v294_v8 }
 0x197   :  { %564 = vperm.xlu1 %1093, %v519_v47   ;;  %v894_v53 = vsel %vm322_vm8, 1.0, %v1174_v33  ;;  %vm574_vm8 = vcmp.eq.s32.totalorder %v1322_v25, %v538_v32 }
 0x198   :  { %v370_v55 = vadd.f32 %v894_v53, %v878_v48  ;;  %v922_v36 = vsel %vm574_vm8, 1.0, %v1174_v33 }
 0x199   :  { %v622_v42 = vadd.f32 %v922_v36, %v494_v39 }
 0x19a   :  { %v422_v52 = vpop.permute.xlu1 %421 }
 0x19b   :  { %vm450_vm10 = vcmp.eq.s32.totalorder %v1322_v25, %v422_v52  ;;  %543 = vperm.xlu1 %1093, %v512_v50  }
 0x19c   :  { %v910_v54 = vsel %vm450_vm10, 1.0, %v1174_v33 }
 0x19d   :  { %v498_v56 = vadd.f32 %v910_v54, %v370_v55 }
 0x19f   :  { %v550_v11 = vpop.permute.xlu1 %549 }
 0x1a0   :  { %vm578_vm11 = vcmp.eq.s32.totalorder %v1322_v25, %v550_v11 }
 0x1a1   :  { %v926_v45 = vsel %vm578_vm11, 1.0, %v1174_v33 }
 0x1a2   :  { %v626_v58 = vadd.f32 %v926_v45, %v498_v56 }
 0x1a4   :  { %1002 = vmatmul.mubr.msk.f32.vlgmr.msra.gmra.mrb[0].mxu1 %vm641_vm5, %v626_v58  ;;  %v169_v59 = vpop.permute.xlu1 %168 }
 0x1a5   :  { %vm195_vm13 = vcmp.eq.s32.totalorder %v1322_v25, %v169_v59 }
 0x1a6   :  { %v879_v63 = vsel %vm195_vm13, 1.0, %v1174_v33 }
 0x1a9   :  { %v297_v13 = vpop.permute.xlu1 %296 }
 0x1aa   :  { %vm323_vm12 = vcmp.eq.s32.totalorder %v1322_v25, %v297_v13 }
 0x1ab   :  { %v895_v61 = vsel %vm323_vm12, 1.0, %v1174_v33  ;;  %vm199_vm12 = vcmp.eq.s32.totalorder %v1322_v25, %v1423_v49 }
 0x1ac   :  { %v371_v3 = vadd.f32 %v895_v61, %v879_v63  ;;  %v883_v8 = vsel %vm199_vm12, 1.0, %v1174_v33  ;;  %vm200_vm12 = vcmp.eq.s32.totalorder %v1322_v25, %v1430_v51 }
 0x1ae   :  { %v425_v2 = vpop.permute.xlu1 %424 }
 0x1af   :  { %vm451_vm15 = vcmp.eq.s32.totalorder %v1322_v25, %v425_v2 }
 0x1b0   :  { %v911_v4 = vsel %vm451_vm15, 1.0, %v1174_v33  ;;  %vm455_vm15 = vcmp.eq.s32.totalorder %v1322_v25, %v1437_v60 }
 0x1b1   :  { %v499_v5 = vadd.f32 %v911_v4, %v371_v3  ;;  %v915_v53 = vsel %vm455_vm15, 1.0, %v1174_v33  ;;  %v541_v4 = vpop.permute.xlu0 %540 }
 0x1b2   :  { %vm575_vm9 = vcmp.eq.s32.totalorder %v1322_v25, %v541_v4 }
 0x1b3   :  { %v627_v7 = vadd.f32 %v927_v6, %v499_v5  ;;  %v172_v9 = vpop.permute.xlu1 %171 }
 0x1b4   :  { %vm196_vm1 = vcmp.eq.s32.totalorder %v1322_v25, %v172_v9 }
 0x1b5   :  { %1004 = vmatprep.mubr.msk.f32.mxu1 %vm641_vm5, %v627_v7  ;;  %v880_v16 = vsel %vm196_vm1, 1.0, %v1174_v33 }
 0x1b8   :  { %v300_v10 = vpop.permute.xlu1 %299 }
 0x1b9   :  { %vm324_vm0 = vcmp.eq.s32.totalorder %v1322_v25, %v300_v10 }
 0x1ba   :  { %v896_v12 = vsel %vm324_vm0, 1.0, %v1174_v33 }
 0x1bb   :  { %v372_v18 = vadd.f32 %v896_v12, %v880_v16  ;;  %v923_v16 = vsel %vm575_vm9, 1.0, %v1174_v33 }
 0x1bd   :  { %v428_v17 = vpop.permute.xlu1 %427 }
 0x1be   :  { %vm452_vm3 = vcmp.eq.s32.totalorder %v1322_v25, %v428_v17 }
 0x1bf   :  { %v912_v19 = vsel %vm452_vm3, 1.0, %v1174_v33 }
 0x1c0   :  { %v500_v21 = vadd.f32 %v912_v19, %v372_v18 }
 0x1c2   :  { %v628_v24 = vadd.f32 %v928_v22, %v500_v21  ;;  %v175_v26 = vpop.permute.xlu1 %174  ;;  %v884_v22 = vsel %vm200_vm12, 1.0, %v1174_v33 }
 0x1c3   :  { %vm197_vm13 = vcmp.eq.s32.totalorder %v1322_v25, %v175_v26 }
 0x1c4   :  { %1005 = vmatmul.mubr.msk.f32.gmra.mrb[2].mxu1 %vm641_vm5, %v628_v24  ;;  %v881_v50 = vsel %vm197_vm13, 1.0, %v1174_v33  ;;  %v568_v24 = vpop.permute.xlu0 %567 }
 0x1c7   :  { %v303_v27 = vpop.permute.xlu1 %302 }
 0x1c8   :  { %vm325_vm11 = vcmp.eq.s32.totalorder %v1322_v25, %v303_v27 }
 0x1c9   :  { %v897_v46 = vsel %vm325_vm11, 1.0, %v1174_v33 }
 0x1ca   :  { %v373_v48 = vadd.f32 %v897_v46, %v881_v50 }
 0x1cc   :  { %v178_v29 = vpop.permute.xlu1 %177 }
 0x1cd   :  { %vm198_vm3 = vcmp.eq.s32.totalorder %v1322_v25, %v178_v29 }
 0x1ce   :  { %v882_v13 = vsel %vm198_vm3, 1.0, %v1174_v33 }
 0x1d1   :  { %v306_v31 = vpop.permute.xlu1 %305 }
 0x1d2   :  { %vm326_vm2 = vcmp.eq.s32.totalorder %v1322_v25, %v306_v31 }
 0x1d3   :  { %v898_v60 = vsel %vm326_vm2, 1.0, %v1174_v33 }
 0x1d4   :  { %v374_v62 = vadd.f32 %v898_v60, %v882_v13 }
 0x1d6   :  { %v407_v34 = vpop.permute.xlu1 %406 }
 0x1d7   :  { %vm445_vm10 = vcmp.eq.s32.totalorder %v1322_v25, %v407_v34 }
 0x1d8   :  { %v905_v23 = vsel %vm445_vm10, 1.0, %v1174_v33 }
 0x1d9   :  { %v493_v37 = vadd.f32 %v905_v23, %v365_v1 }
 0x1da   :  { %v431_v40 = vpop.permute.xlu1 %430 }
 0x1db   :  { %v621_v41 = vadd.f32 %v921_v38, %v493_v37  ;;  %vm453_vm14 = vcmp.eq.s32.totalorder %v1322_v25, %v431_v40 }
 0x1dc   :  { %v913_v49 = vsel %vm453_vm14, 1.0, %v1174_v33 }
 0x1dd   :  { %995 = vmatprep.mubr.msk.f32.mxu0 %vm641_vm5, %v621_v41  ;;  %v501_v11 = vadd.f32 %v913_v49, %v373_v48 }
 0x1de   :  { %v434_v43 = vpop.permute.xlu1 %433  ;;  %996 = vmatmul.mubr.msk.f32.gmra.mrb[4].mxu0 %vm641_vm5, %v622_v42 }
 0x1df   :  { %vm454_vm4 = vcmp.eq.s32.totalorder %v1322_v25, %v434_v43 }
 0x1e0   :  { %v914_v61 = vsel %vm454_vm4, 1.0, %v1174_v33 }
 0x1e1   :  { %v502_v2 = vadd.f32 %v914_v61, %v374_v62 }
 0x1e3   :  { %v157_v44 = vpop.permute.xlu1 %156 }
 0x1e4   :  { %vm191_vm8 = vcmp.eq.s32.totalorder %v1322_v25, %v157_v44 }
 0x1e5   :  { %v875_v7 = vsel %vm191_vm8, 1.0, %v1174_v33 }
 0x1e8   :  { %v285_v0 = vpop.permute.xlu1 %284 }
 0x1e9   :  { %vm319_vm6 = vcmp.eq.s32.totalorder %v1322_v25, %v285_v0 }
 0x1ea   :  { %v891_v5 = vsel %vm319_vm6, 1.0, %v1174_v33 }
 0x1eb   :  { %v367_v10 = vadd.f32 %v891_v5, %v875_v7 }
 0x1ec   :  { %v309_v20 = vpop.permute.xlu1 %308 }
 0x1ed   :  { %vm327_vm0 = vcmp.eq.s32.totalorder %v1322_v25, %v309_v20 }
 0x1ee   :  { %v899_v47 = vsel %vm327_vm0, 1.0, %v1174_v33 }
 0x1ef   :  { %v375_v52 = vadd.f32 %v899_v47, %v883_v8 }
 0x1f1   :  { %v559_v54 = vpop.permute.xlu1 %558  ;;  %v503_v55 = vadd.f32 %v915_v53, %v375_v52 }
 0x1f2   :  { %vm581_vm1 = vcmp.eq.s32.totalorder %v1322_v25, %v559_v54 }
 0x1f3   :  { %v929_v56 = vsel %vm581_vm1, 1.0, %v1174_v33  ;;  %vm584_vm1 = vcmp.eq.s32.totalorder %v1322_v25, %v568_v24 }
 0x1f4   :  { %v629_v45 = vadd.f32 %v929_v56, %v501_v11  ;;  %v932_v28 = vsel %vm584_vm1, 1.0, %v1174_v33 }
 0x1f6   :  { %v160_v57 = vpop.permute.xlu1 %159  ;;  %1007 = vmatprep.mubr.msk.f32.mxu1 %vm641_vm5, %v629_v45 }
 0x1f7   :  { %vm192_vm15 = vcmp.eq.s32.totalorder %v1322_v25, %v160_v57 }
 0x1f8   :  { %v876_v31 = vsel %vm192_vm15, 1.0, %v1174_v33 }
 0x1fb   :  { %v288_v58 = vpop.permute.xlu1 %287 }
 0x1fc   :  { %vm320_vm14 = vcmp.eq.s32.totalorder %v1322_v25, %v288_v58 }
 0x1fd   :  { %v892_v51 = vsel %vm320_vm14, 1.0, %v1174_v33 }
 0x1fe   :  { %v368_v34 = vadd.f32 %v892_v51, %v876_v31 }
 0x1ff   :  { %v312_v59 = vpop.permute.xlu1 %311 }
 0x200   :  { %vm328_vm11 = vcmp.eq.s32.totalorder %v1322_v25, %v312_v59 }
 0x201   :  { %v900_v19 = vsel %vm328_vm11, 1.0, %v1174_v33 }
 0x202   :  { %v376_v27 = vadd.f32 %v900_v19, %v884_v22 }
 0x204   :  { %v562_v63 = vpop.permute.xlu1 %561 }
 0x205   :  { %vm582_vm7 = vcmp.eq.s32.totalorder %v1322_v25, %v562_v63 }
 0x206   :  { %v930_v3 = vsel %vm582_vm7, 1.0, %v1174_v33 }
 0x207   :  { %v630_v6 = vadd.f32 %v930_v3, %v502_v2 }
 0x209   :  { %v413_v9 = vpop.permute.xlu1 %412  ;;  %1008 = vmatmul.mubr.msk.f32.gmra.mrb[4].mxu1 %vm641_vm5, %v630_v6 }
 0x20a   :  { %vm447_vm10 = vcmp.eq.s32.totalorder %v1322_v25, %v413_v9 }
 0x20b   :  { %v907_v12 = vsel %vm447_vm10, 1.0, %v1174_v33 }
 0x20c   :  { %v495_v15 = vadd.f32 %v907_v12, %v367_v10 }
 0x20d   :  { %v416_v17 = vpop.permute.xlu1 %415 }
 0x20e   :  { %v623_v18 = vadd.f32 %v923_v16, %v495_v15  ;;  %vm448_vm0 = vcmp.eq.s32.totalorder %v1322_v25, %v416_v17 }
 0x20f   :  { %v908_v32 = vsel %vm448_vm0, 1.0, %v1174_v33 }
 0x210   :  { %998 = vmatprep.mubr.msk.f32.mxu0 %vm641_vm5, %v623_v18  ;;  %v496_v36 = vadd.f32 %v908_v32, %v368_v34 }
 0x211   :  { %v440_v21 = vpop.permute.xlu1 %439 }
 0x212   :  { %vm456_vm13 = vcmp.eq.s32.totalorder %v1322_v25, %v440_v21 }
 0x213   :  { %v916_v26 = vsel %vm456_vm13, 1.0, %v1174_v33 }
 0x214   :  { %v504_v29 = vadd.f32 %v916_v26, %v376_v27 }
 0x216   :  { %v565_v30 = vpop.permute.xlu1 %564  ;;  %v632_v23 = vadd.f32 %v932_v28, %v504_v29 }
 0x217   :  { %vm583_vm2 = vcmp.eq.s32.totalorder %v1322_v25, %v565_v30 }
 0x218   :  { %v931_v14 = vsel %vm583_vm2, 1.0, %v1174_v33 }
 0x219   :  { %v631_v1 = vadd.f32 %v931_v14, %v503_v55 }
 0x21a   :  { %v544_v35 = vpop.permute.xlu1 %543 }
 0x21b   :  { %vm576_vm3 = vcmp.eq.s32.totalorder %v1322_v25, %v544_v35  ;;  %1010 = vmatprep.mubr.msk.f32.mxu1 %vm641_vm5, %v631_v1 }
 0x21c   :  { %v924_v37 = vsel %vm576_vm3, 1.0, %v1174_v33  ;;  %1011 = vmatmul.mubr.msk.f32.gmra.mrb[6].mxu1 %vm641_vm5, %v632_v23 }
 0x21d   :  { %v624_v38 = vadd.f32 %v924_v37, %v496_v36 }
 0x21f   :  { %999 = vmatmul.mubr.msk.f32.gmra.mrb[6].mxu0 %vm641_vm5, %v624_v38 }
 0x222   :  { %v991_v39 = vpop.f32.mrb[0].mxu0 }
 0x223   :  { %836 = vst [vmem:[#allocation7 + $0x8] sm:$0xff] %v991_v39  ;;  %v756_v40 = vpop.f32.mrb[1].mxu0 }
 0x224   :  { %835 = vst [vmem:[#allocation7] sm:$0xff] %v756_v40 }
 0x24f   :  { %v994_v41 = vpop.f32.mrb[2].mxu0 }
 0x250   :  { %838 = vst [vmem:[#allocation7 + $0x18] sm:$0xff] %v994_v41  ;;  %v766_v42 = vpop.f32.mrb[3].mxu0 }
 0x251   :  { %837 = vst [vmem:[#allocation7 + $0x10] sm:$0xff] %v766_v42 }
 0x277   :  { %v1003_v43 = vpop.f32.mrb[0].mxu1 }
 0x278   :  { %844 = vst [vmem:[#allocation7 + $0x48] sm:$0xff] %v1003_v43  ;;  %v796_v25 = vpop.f32.mrb[1].mxu1 }
 0x279   :  { %843 = vst [vmem:[#allocation7 + $0x40] sm:$0xff] %v796_v25 }
 0x297   :  { %v1006_v44 = vpop.f32.mrb[2].mxu1 }
 0x298   :  { %846 = vst [vmem:[#allocation7 + $0x58] sm:$0xff] %v1006_v44  ;;  %v806_v33 = vpop.f32.mrb[3].mxu1 }
 0x299   :  { %845 = vst [vmem:[#allocation7 + $0x50] sm:$0xff] %v806_v33 }
 0x2b1   :  { %v997_v0 = vpop.f32.mrb[4].mxu0 }
 0x2b2   :  { %840 = vst [vmem:[#allocation7 + $0x28] sm:$0xff] %v997_v0  ;;  %v776_v20 = vpop.f32.mrb[5].mxu0 }
 0x2b3   :  { %839 = vst [vmem:[#allocation7 + $0x20] sm:$0xff] %v776_v20 }
 0x2dc   :  { %v1009_v46 = vpop.f32.mrb[4].mxu1 }
 0x2dd   :  { %848 = vst [vmem:[#allocation7 + $0x68] sm:$0xff] %v1009_v46  ;;  %v816_v8 = vpop.f32.mrb[5].mxu1 }
 0x2de   :  { %847 = vst [vmem:[#allocation7 + $0x60] sm:$0xff] %v816_v8 }
 0x2ef   :  { %v1012_v47 = vpop.f32.mrb[6].mxu1 }
 0x2f0   :  { %850 = vst [vmem:[#allocation7 + $0x78] sm:$0xff] %v1012_v47  ;;  %v826_v50 = vpop.f32.mrb[7].mxu1 }
 0x2f1   :  { %849 = vst [vmem:[#allocation7 + $0x70] sm:$0xff] %v826_v50 }
 0x2f2   :  { %v1000_v49 = vpop.f32.mrb[6].mxu0 }
 0x2f3   :  { %842 = vst [vmem:[#allocation7 + $0x38] sm:$0xff] %v1000_v49  ;;  %v786_v52 = vpop.f32.mrb[7].mxu0 }
 0x2f4   :  { %841 = vst [vmem:[#allocation7 + $0x30] sm:$0xff] %v786_v52 }
 0x2f5   :  { %1149 = shalt.err (!%p1146_p6)
}
 0x2f6   :  { %s1150_s10 = scalar_lea.hbm %s1548_s2, 2048 }
 0x2f7   :  { %p1151_p7 = scmp.ne.s32.totalorder %s1548_s2, %s1150_s10  ;;  %p1154_p8 = scmp.lt.u32.totalorder %s1150_s10, %s1548_s2 }
 0x2f9   :  { %p1156_p9 = pnand %p1154_p8, %p1151_p7 }
 0x2fb   :  { %1159 = shalt.err (!%p1156_p9)
}
 0x2fc   :  { %862 = dma.vmem_to_hbm [thread:$0]  %s857_s6, 2048, %s1548_s2, [#allocation4], %s1168_s0, %s1168_s0, %s1169_s3  }
 0x2fd   :  { %1164 = dma.done.wait [#allocation4], 2048  }
 0x2fe   :  { %1165 = vsyncadd [#allocation4], 4294965248 }
 0x2ff   :  { %866 = vsyncpa [#allocation3], 1 }
 0x300   :  { %867 = vsyncpa [#allocation6], 1 }
 0x301   :  { %868 = vsyncpa [#allocation4], 1 }

</bundles_post_ra>
